<compile_context>
chip_gen: v7x
topology: tpu7x:2x2x1
jax: 0.10.0
libtpu: 0.0.40
codegen_flags: <defaults>
</compile_context>

<pallas_src>
import math
import numpy as np
import jax
import jax.numpy as jnp
from jax.experimental import pallas as pl
from jax.experimental.pallas import tpu as pltpu


# ----------------------------------------------------------------------------
# Parameter setup (host-side glue): reproduces GaussianSmoothing.__init__
# ----------------------------------------------------------------------------
def make_gaussian_taps_1d(kernel_size, sigma, dim=2):
    """Per-dimension normalized 1-D taps as tuples of Python floats.

    Uses the module's exact (quirky) formula per dimension:
        1/(std*sqrt(2*pi)) * exp(-((x - mean) / (2*std))**2)
    Normalizing each 1-D factor separately is mathematically identical to
    normalizing their outer product (sum(outer(a, b)) == sum(a) * sum(b)).
    """
    if isinstance(kernel_size, (int, float)):
        kernel_size = [int(kernel_size)] * dim
    if isinstance(sigma, (int, float)):
        sigma = [float(sigma)] * dim
    taps = []
    for size, std in zip(kernel_size, sigma):
        mean = (size - 1) / 2.0
        x = np.arange(size, dtype=np.float32)
        k = (1.0 / (std * math.sqrt(2.0 * math.pi))) * np.exp(
            -(((x - mean) / (2.0 * std)) ** 2)
        )
        k = k / k.sum()
        taps.append(tuple(float(v) for v in k))
    return taps


def make_gaussian_weight_2d(channels, kernel_size, sigma, dim=2):
    """Full (C, K, K) depthwise weight exactly as the PyTorch module builds it
    (used only for the numpy reference check)."""
    if isinstance(kernel_size, (int, float)):
        kernel_size = [int(kernel_size)] * dim
    if isinstance(sigma, (int, float)):
        sigma = [float(sigma)] * dim
    grids = np.meshgrid(
        *[np.arange(s, dtype=np.float32) for s in kernel_size], indexing="ij"
    )
    kernel = np.ones((), dtype=np.float32)
    for size, std, g in zip(kernel_size, sigma, grids):
        mean = (size - 1) / 2.0
        kernel = kernel * (
            1.0 / (std * math.sqrt(2.0 * math.pi))
            * np.exp(-(((g - mean) / (2.0 * std)) ** 2))
        )
    kernel = kernel / kernel.sum()
    return np.broadcast_to(kernel, (channels,) + kernel.shape).copy()


# ----------------------------------------------------------------------------
# Pallas kernel: separable depthwise valid conv, one channel image per block
# ----------------------------------------------------------------------------
def _make_kernel(kh, kw, h_blk, wo):
    """kh/kw: 1-D tap tuples (Python floats).  h_blk: output rows per grid
    step (divides Ho exactly).  wo: output width.
    Block layout: x_ref (H, W), o_ref (h_blk, Wo) -- W on lanes, rows on
    sublanes; the channel axis is squeezed out by the BlockSpec."""
    n_kh, n_kw = len(kh), len(kw)
    rows_needed = h_blk + n_kh - 1  # output rows + vertical halo

    def gaussian_smooth_kernel(x_ref, o_ref):
        row0 = pl.program_id(1) * h_blk
        if h_blk % 8 == 0:
            row0 = pl.multiple_of(row0, 8)
        # Load + upcast exactly the rows needed for this block (in-bounds by
        # construction: last block reaches Ho + K - 1 == H).
        x = x_ref[pl.ds(row0, rows_needed), :].astype(jnp.float32)

        # Horizontal pass: 1-D taps along W (lane axis).
        tmp = kw[0] * x[:, 0:wo]
        for j in range(1, n_kw):
            tmp = tmp + kw[j] * x[:, j:j + wo]

        # Vertical pass: 1-D taps along H (sublane axis).
        acc = kh[0] * tmp[0:h_blk, :]
        for r in range(1, n_kh):
            acc = acc + kh[r] * tmp[r:r + h_blk, :]

        o_ref[...] = acc.astype(o_ref.dtype)

    return gaussian_smooth_kernel


def _pick_h_blk(ho, target_rows=512, min_rows=8):
    """Output rows per grid step.  Only row-block when Ho is large and an
    8-aligned divisor in [min_rows, target_rows] exists; otherwise process
    the whole channel in one block (avoids the h_blk=1 cliff and tail/halo
    out-of-bounds handling)."""
    if ho <= target_rows:
        return ho
    for h in range(target_rows, min_rows - 1, -1):
        if h % 8 == 0 and ho % h == 0:
            return h
    return ho


def _pick_vmem_limit():
    """VMEM budget from physical capacity with headroom for Mosaic scratch:
    ~48 MiB on v7x (64 MiB physical), ~112 MiB on v5e/v6e (128 MiB)."""
    default = 48 * 1024 * 1024
    try:
        info = pltpu.get_tpu_info()
        cap = getattr(info, "vmem_capacity_bytes", None)
        if not cap:
            return default
        return int(max(32 * 1024 * 1024,
                       min(cap - 16 * 1024 * 1024, 112 * 1024 * 1024)))
    except Exception:
        return default


def gaussian_smoothing(x, taps):
    """x: (N, C, H, W) float array; taps: [kh, kw] 1-D Gaussian taps.
    Returns (N, C, H-Kh+1, W-Kw+1), matching F.conv2d(groups=C, no padding)."""
    N, C, H, W = x.shape
    kh, kw = taps
    n_kh, n_kw = len(kh), len(kw)
    Ho, Wo = H - n_kh + 1, W - n_kw + 1
    NC = N * C

    # Free metadata reshape: no HBM transpose passes.
    x_flat = x.reshape(NC, H, W)

    h_blk = _pick_h_blk(Ho)
    n_blk = Ho // h_blk

    out_flat = pl.pallas_call(
        _make_kernel(kh, kw, h_blk, Wo),
        out_shape=jax.ShapeDtypeStruct((NC, Ho, Wo), x.dtype),
        grid=(NC, n_blk),
        in_specs=[
            # One full channel image per block; index depends only on the
            # channel (outer grid axis), so the inner row-block axis reuses
            # the already-resident block (no redundant DMA).
            pl.BlockSpec((None, H, W), lambda c, i: (c, 0, 0)),
        ],
        out_specs=pl.BlockSpec((None, h_blk, Wo), lambda c, i: (c, i, 0)),
        compiler_params=pltpu.CompilerParams(
            dimension_semantics=("parallel", "arbitrary"),
            vmem_limit_bytes=_pick_vmem_limit(),
        ),
    )(x_flat)

    return out_flat.reshape(N, C, Ho, Wo)


# ----------------------------------------------------------------------------
# Reference (numpy) depthwise valid conv, for verification
# ----------------------------------------------------------------------------
def reference_conv(x, weight):
    x = np.asarray(x)
    w = np.asarray(weight)
    N, C, H, W = x.shape
    _, K1, K2 = w.shape
    Ho, Wo = H - K1 + 1, W - K2 + 1
    out = np.zeros((N, C, Ho, Wo), dtype=np.float64)
    for ki in range(K1):
        for kj in range(K2):
            out += w[None, :, ki, kj, None, None] * x[:, :, ki:ki + Ho, kj:kj + Wo]
    return out.astype(x.dtype)


if __name__ == "__main__":
    channels = 4
    kernel_size = 5
    sigma = 1.0
    dim = 2

    taps = make_gaussian_taps_1d(kernel_size, sigma, dim=dim)
    weight2d = make_gaussian_weight_2d(channels, kernel_size, sigma, dim=dim)

    key = jax.random.PRNGKey(0)
    x = jax.random.normal(key, (2, channels, 16, 16), dtype=jnp.float32)

    out = gaussian_smoothing(x, taps)
    out = jax.block_until_ready(out)

    ref = reference_conv(np.asarray(x), weight2d)
    assert out.shape == (2, channels, 12, 12), out.shape
    np.testing.assert_allclose(np.asarray(out), ref, rtol=1e-5, atol=1e-5)

    print("KERNEL_OK")
</pallas_src>

<mosaic_0001>
module attributes {stable_mosaic.version = 11 : i64} {
  func.func @gaussian_smooth_kernel(%arg0: i32, %arg1: i32, %arg2: memref<1x16x16xf32, #tpu.memory_space<vmem>>, %arg3: memref<1x12x12xf32, #tpu.memory_space<vmem>>) attributes {dimension_semantics = [#tpu.dimension_semantics<parallel>, #tpu.dimension_semantics<arbitrary>], iteration_bounds = array<i64: 8, 1>, scalar_prefetch = 0 : i64, scratch_operands = 0 : i64, tpu.core_type = #tpu.core_type<tc>, window_params = [{transform_indices = @transform_0, window_bounds = array<i64: 1, 16, 16>}, {transform_indices = @transform_1, window_bounds = array<i64: 1, 12, 12>}]} {
    %c12_i32 = arith.constant 12 : i32
    %0 = arith.muli %arg1, %c12_i32 : i32
    %c0 = arith.constant 0 : index
    %1 = arith.index_cast %0 : i32 to index
    %c0_0 = arith.constant 0 : index
    %2 = vector.load %arg2[%c0, %1, %c0_0] : memref<1x16x16xf32, #tpu.memory_space<vmem>>, vector<1x16x16xf32>
    %3 = vector.shape_cast %2 : vector<1x16x16xf32> to vector<16x16xf32>
    %4 = vector.extract_strided_slice %3 {offsets = [0, 0], sizes = [16, 12], strides = [1, 1]} : vector<16x16xf32> to vector<16x12xf32>
    %cst = arith.constant 0.111703366 : f32
    %5 = vector.broadcast %cst : f32 to vector<16x12xf32>
    %6 = arith.mulf %5, %4 : vector<16x12xf32>
    %7 = vector.extract_strided_slice %3 {offsets = [0, 1], sizes = [16, 12], strides = [1, 1]} : vector<16x16xf32> to vector<16x12xf32>
    %cst_1 = arith.constant 0.236476019 : f32
    %8 = vector.broadcast %cst_1 : f32 to vector<16x12xf32>
    %9 = arith.mulf %8, %7 : vector<16x12xf32>
    %10 = arith.addf %6, %9 : vector<16x12xf32>
    %11 = vector.extract_strided_slice %3 {offsets = [0, 2], sizes = [16, 12], strides = [1, 1]} : vector<16x16xf32> to vector<16x12xf32>
    %cst_2 = arith.constant 0.30364126 : f32
    %12 = vector.broadcast %cst_2 : f32 to vector<16x12xf32>
    %13 = arith.mulf %12, %11 : vector<16x12xf32>
    %14 = arith.addf %10, %13 : vector<16x12xf32>
    %15 = vector.extract_strided_slice %3 {offsets = [0, 3], sizes = [16, 12], strides = [1, 1]} : vector<16x16xf32> to vector<16x12xf32>
    %cst_3 = arith.constant 0.236476019 : f32
    %16 = vector.broadcast %cst_3 : f32 to vector<16x12xf32>
    %17 = arith.mulf %16, %15 : vector<16x12xf32>
    %18 = arith.addf %14, %17 : vector<16x12xf32>
    %19 = vector.extract_strided_slice %3 {offsets = [0, 4], sizes = [16, 12], strides = [1, 1]} : vector<16x16xf32> to vector<16x12xf32>
    %cst_4 = arith.constant 0.111703366 : f32
    %20 = vector.broadcast %cst_4 : f32 to vector<16x12xf32>
    %21 = arith.mulf %20, %19 : vector<16x12xf32>
    %22 = arith.addf %18, %21 : vector<16x12xf32>
    %23 = vector.extract_strided_slice %22 {offsets = [0, 0], sizes = [12, 12], strides = [1, 1]} : vector<16x12xf32> to vector<12x12xf32>
    %cst_5 = arith.constant 0.111703366 : f32
    %24 = vector.broadcast %cst_5 : f32 to vector<12x12xf32>
    %25 = arith.mulf %24, %23 : vector<12x12xf32>
    %26 = vector.extract_strided_slice %22 {offsets = [1, 0], sizes = [12, 12], strides = [1, 1]} : vector<16x12xf32> to vector<12x12xf32>
    %cst_6 = arith.constant 0.236476019 : f32
    %27 = vector.broadcast %cst_6 : f32 to vector<12x12xf32>
    %28 = arith.mulf %27, %26 : vector<12x12xf32>
    %29 = arith.addf %25, %28 : vector<12x12xf32>
    %30 = vector.extract_strided_slice %22 {offsets = [2, 0], sizes = [12, 12], strides = [1, 1]} : vector<16x12xf32> to vector<12x12xf32>
    %cst_7 = arith.constant 0.30364126 : f32
    %31 = vector.broadcast %cst_7 : f32 to vector<12x12xf32>
    %32 = arith.mulf %31, %30 : vector<12x12xf32>
    %33 = arith.addf %29, %32 : vector<12x12xf32>
    %34 = vector.extract_strided_slice %22 {offsets = [3, 0], sizes = [12, 12], strides = [1, 1]} : vector<16x12xf32> to vector<12x12xf32>
    %cst_8 = arith.constant 0.236476019 : f32
    %35 = vector.broadcast %cst_8 : f32 to vector<12x12xf32>
    %36 = arith.mulf %35, %34 : vector<12x12xf32>
    %37 = arith.addf %33, %36 : vector<12x12xf32>
    %38 = vector.extract_strided_slice %22 {offsets = [4, 0], sizes = [12, 12], strides = [1, 1]} : vector<16x12xf32> to vector<12x12xf32>
    %cst_9 = arith.constant 0.111703366 : f32
    %39 = vector.broadcast %cst_9 : f32 to vector<12x12xf32>
    %40 = arith.mulf %39, %38 : vector<12x12xf32>
    %41 = arith.addf %37, %40 : vector<12x12xf32>
    %c0_10 = arith.constant 0 : index
    %c0_11 = arith.constant 0 : index
    %c0_12 = arith.constant 0 : index
    %42 = vector.load %arg3[%c0_10, %c0_11, %c0_12] : memref<1x12x12xf32, #tpu.memory_space<vmem>>, vector<1x12x12xf32>
    %43 = vector.shape_cast %42 : vector<1x12x12xf32> to vector<12x12xf32>
    %44 = vector.shape_cast %41 : vector<12x12xf32> to vector<1x12x12xf32>
    tpu.vector_store %arg3[%c0_10, %c0_11, %c0_12], %44 {strides = array<i32>} : memref<1x12x12xf32, #tpu.memory_space<vmem>>, vector<1x12x12xf32>,
    return
  }
  func.func @transform_0(%arg0: i32, %arg1: i32) -> (i32, i32, i32) {
    %c0_i32 = arith.constant 0 : i32
    %c0_i32_0 = arith.constant 0 : i32
    %c0_i32_1 = arith.constant 0 : i32
    return %arg0, %c0_i32, %c0_i32_0 : i32, i32, i32
  }
  func.func @transform_1(%arg0: i32, %arg1: i32) -> (i32, i32, i32) {
    %c0_i32 = arith.constant 0 : i32
    %c0_i32_0 = arith.constant 0 : i32
    return %arg0, %arg1, %c0_i32 : i32, i32, i32
  }
}

</mosaic_0001>

<bundles_post_ra>
// kernel: tpu_custom_call.1
= control target key start
LH: loop header
LB: loop body
LE: loop exit
PB: predicated region body
PF: predicated region fallthrough
CT: control target
= control target key end

     0   :  { %6 = vsyncpa [#allocation3], 0  ;;  %s649_s0 = inlined_call_operand.hbm [shape: f32[8,16,16], index: 0, kind: input, shape index: {}]   ;;  %s650_s1 = inlined_call_operand.vmem [shape: f32[8,12,12], index: 1, kind: output, shape index: {}]  }
   0x1   :  { %8 = vsyncpa [#allocation3 + $0x1], 0  ;;  %s525_s6 = smov 0   ;;  %s527_s7 = smov 0  }
   0x2   :  { %s529_s8 = smov 0   ;;  %s531_s9 = smov 0  }
   0x3   :  { %s533_s10 = smov 0   ;;  %s535_s11 = smov 0  }
   0x4 LB: > { %s350_s12 = sadd.s32 4294967295, %s506_s11   ;;  %s26_s13 = sadd.s32 1, %s502_s10  ;;  %s506_s11 = sphi %s535_s11, %s14_s11   ;;  %s502_s10 = sphi %s533_s10, %s658_s10   ;;  %s498_s9 = sphi %s531_s9, %s657_s9   ;;  %s494_s8 = sphi %s529_s8, %s656_s8   ;;  %s490_s7 = sphi %s527_s7, %s655_s7   ;;  %s486_s6 = sphi %s525_s6, %s654_s6  }
   0x5   : > { %p28_p0 = scmp.ge.s32.totalorder %s26_s13, 8  ;;  %s33_s14 = sadd.s32 1, %s494_s8 }
   0x6   : > { %p40_p1 = scmp.ne.s32.totalorder %s494_s8, %s490_s7  ;;  %p41_p2 = scmp.eq.s32.totalorder %s506_s11, 0 }
   0x7   : > { %s660_s13 = smov (%p28_p0, %s26_s13), 0  ;;  %p46_p4 = scmp.ne.s32.totalorder %s490_s7, %s486_s6 }
   0x8   : > { %p561_p3 = por %p41_p2, %p40_p1  ;;  %s30_s16 = ssub.s32 %s502_s10, %s660_s13 }
   0x9   : > { %p47_p5 = scmp.eq.s32.totalorder %s350_s12, 0  ;;  %p31_p6 = scmp.eq.s32.totalorder %s30_s16, 0 }
   0xa   : > { %p371_p8 = scmp.lt.s32.totalorder %s506_s11, 8  ;;  %s98_s19 = sand.u32 1, %s494_s8  }
   0xb   : > { %p568_p7 = por %p47_p5, %p46_p4  ;;  %s363_s20 = sshll.u32 %s502_s10, 8 }
   0xc   : > { %s574_s18 = scalar_select %p31_p6, %s494_s8, %s33_s14  }
   0xd   : > { %s354_s21 = sshll.u32 %s98_s19, 4  ;;  %s581_s24 = scalar_lea.hbm %s649_s0, %s363_s20 }
   0xe   : > { %s102_s25 = scalar_lea.vmem [#allocation2], %s354_s21  ;;  %p585_p9 = pnand %p371_p8, %p561_p3 }
   0xf   : > { %s109_s26 = sshll.u32 %s102_s25, 4  ;;  %s591_s28 = scalar_lea.sflag [#allocation3], %s98_s19  ;;  %s589_s26 = int_to_ptr.vmem [resolvable:$true] %s109_s26 }
  0x10   : > { %s426_s29 = scalar_lea.hbm %s581_s24, 256  ;;  %p428_p11 = pneg %p585_p9 }
  0x11   : > { %p427_p10 = scmp.ne.s32.totalorder %s581_s24, %s426_s29  ;;  %s431_s3 = scalar_lea.hbm %s649_s0, 2048 }
  0x12   : > { %p432_p0 = scmp.lt.u32.totalorder %s581_s24, %s649_s0  ;;  %p433_p1 = scmp.lt.u32.totalorder %s431_s3, %s426_s29 }
  0x13   : > { %p429_p12 = pnand %p428_p11, %p427_p10  ;;  %p435_p3 = scmp.lt.u32.totalorder %s426_s29, %s581_s24 }
  0x14   : > { %p434_p2 = por %p433_p1, %p432_p0 }
  0x15   : > { %p430_p13 = pneg %p429_p12 }
  0x16   : > { %p436_p4 = por %p435_p3, %p434_p2 }
  0x18   : > { %p437_p5 = pnand %p436_p4, %p430_p13 }
  0x1a   : > { %440 = shalt.err (!%p437_p5)
}
  0x1b   : > { %s441_s6 = scalar_lea.vmem %s589_s26, 256  ;;  %s508_s12 = smov [#allocation2]  }
  0x1c   : > { %p442_p6 = scmp.ne.s32.totalorder %s589_s26, %s441_s6  ;;  %s446_s14 = sshll.u32 %s508_s12, 4  ;;  %s447_s14 = int_to_ptr.vmem [resolvable:$false] %s446_s14 }
  0x1d   : > { %s448_s15 = scalar_lea.vmem %s447_s14, 512  ;;  %p449_p12 = scmp.lt.s32.totalorder %s589_s26, %s447_s14 }
  0x1e   : > { %p444_p8 = pnand %p442_p6, %p428_p11  ;;  %p450_p0 = scmp.lt.s32.totalorder %s448_s15, %s441_s6 }
  0x20   : > { %p445_p10 = pneg %p444_p8  ;;  %p451_p1 = por %p450_p0, %p449_p12 }
  0x22   : > { %p452_p2 = pnand %p451_p1, %p445_p10 }
  0x24   : > { %455 = shalt.err (!%p452_p2)
}
  0x25   : > { %s509_s16 = smov 128   ;;  %s510_s19 = smov 8  }
  0x26   : > { %370 = dma.hbm_to_vmem [thread:$0]  (!%p585_p9), %s581_s24, 256, %s589_s26, %s591_s28, %s509_s16, %s509_s16, %s510_s19  }
  0x27   : > { %p357_p11 = scmp.ge.s32.totalorder %s506_s11, 1  ;;  %p117_p13 = scmp.lt.s32.totalorder %s506_s11, 9 }
  0x29   : > { %p118_p3 = pnand %p357_p11, %p117_p13 }
  0x2a   : > { %s123_s20 = sand.u32 (!%p118_p3), 1, %s490_s7  }
  0x2b   : > { %121 = sbr.rel (%p118_p3) target bundleno = 197 (0xc5), region = 24  ;;  %s358_s21 = sshll.u32 (!%p118_p3), %s123_s20, 4 }
  0x2c   : > { %s124_s22 = scalar_lea.sflag (!%p118_p3), [#allocation3], %s123_s20  ;;  %s127_s23 = scalar_lea.vmem (!%p118_p3), [#allocation2], %s358_s21 }
  0x32   : > { %481 = dma.done.wait (%p568_p7), %s124_s22, 256  }
  0x33   : > { %483 = vsyncadd (%p568_p7), %s124_s22, 4294967040  ;;  %v162_v0 = vld [vmem:[%s127_s23] sm:$0xff]  ;;  %v163_v1 = vld [vmem:[%s127_s23 + $0x8] sm:$0xff]  ;;  %s511_s24 = smov 126   ;;  %s512_s25 = smov 127   ;;  %vm214_vm0 = vcmask 1046528  }
  0x34   : > { %v178_v2 = vmul.f32 0.30364126, %v162_v0  ;;  %v166_v3 = vmul.f32 0.23647602, %v162_v0  ;;  %v179_v4 = vmul.f32 0.30364126, %v163_v1 }
  0x35   : > { %v167_v5 = vmul.f32 0.23647602, %v163_v1  ;;  %s513_s26 = smov 125   ;;  %v165_v6 = vmul.f32 0.111703366, %v163_v1  ;;  %s514_s27 = smov 124  }
  0x36   : > { %182 = vrot.lane.b32.xlu1 %v178_v2, %s511_s24  ;;  %170 = vrot.lane.b32.xlu0 %v166_v3, %s512_s25  ;;  %v164_v7 = vmul.f32 0.111703366, %v162_v0  ;;  %p151_p7 = scmp.lt.s32.totalorder %s498_s9, 7  ;;  %vm226_vm1 = vcmask 1045504   ;;  %vm234_vm2 = vcmask 1044480   ;;  %vm244_vm3 = vcmask 1043456  }
  0x37   : > { %vm254_vm4 = vcmask 93184   ;;  %vm252_vm5 = vcmask 97280  }
  0x38   : > { %s662_s9 = smov (!%p151_p7, %s498_s9), 7 }
  0x39   : > { %s364_s17 = sshll.u32 %s662_s9, 4 }
  0x3a   : > { %184 = vrot.lane.b32.xlu1 %v179_v4, %s511_s24  ;;  %172 = vrot.lane.b32.xlu0 %v167_v5, %s512_s25  ;;  %s158_s30 = scalar_lea.vmem %s650_s1, %s364_s17 }
  0x3e   : > { %192 = vrot.lane.b32.xlu1 %v167_v5, %s513_s26  ;;  %190 = vrot.lane.b32.xlu0 %v166_v3, %s513_s26 }
  0x42   : > { %202 = vrot.lane.b32.xlu1 %v165_v6, %s514_s27  ;;  %200 = vrot.lane.b32.xlu0 %v164_v7, %s514_s27 }
  0xa8   : > { %v183_v8 = vpop.permute.xlu1 %182  ;;  %v171_v9 = vpop.permute.xlu0 %170 }
  0xa9   : > { %v176_v12 = vadd.f32 %v171_v9, %v164_v7 }
  0xab   : > { %v188_v17 = vadd.f32 %v183_v8, %v176_v12 }
  0xac   : > { %v185_v10 = vpop.permute.xlu1 %184  ;;  %v173_v11 = vpop.permute.xlu0 %172 }
  0xad   : > { %v177_v13 = vadd.f32 %v173_v11, %v165_v6 }
  0xaf   : > { %v189_v14 = vadd.f32 %v185_v10, %v177_v13 }
  0xb0   : > { %v193_v15 = vpop.permute.xlu1 %192  ;;  %v191_v16 = vpop.permute.xlu0 %190 }
  0xb1   : > { %v197_v18 = vadd.f32 %v193_v15, %v189_v14  ;;  %v196_v19 = vadd.f32 %v191_v16, %v188_v17 }
  0xb4   : > { %v203_v20 = vpop.permute.xlu1 %202  ;;  %v201_v21 = vpop.permute.xlu0 %200 }
  0xb5   : > { %v207_v22 = vadd.f32 %v203_v20, %v197_v18  ;;  %v206_v23 = vadd.f32 %v201_v21, %v196_v19 }
  0xb7   : > { %v211_v24 = vmul.f32 0.23647602, %v207_v22  ;;  %v223_v25 = vmul.f32 0.30364126, %v207_v22  ;;  %v210_v26 = vmul.f32 0.23647602, %v206_v23 }
  0xb8   : > { %v222_v27 = vmul.f32 0.30364126, %v206_v23  ;;  %v209_v28 = vmul.f32 0.111703366, %v207_v22  ;;  %v208_v31 = vmul.f32 0.111703366, %v206_v23 }
  0xb9   : > { %v216_v29 = vrot.slane %v211_v24, 1  ;;  %v228_v30 = vrot.slane %v223_v25, 2  ;;  %v215_v32 = vrot.slane %v210_v26, 1  ;;  %v236_v35 = vrot.slane %v211_v24, 3 }
  0xba   : > { %v227_v33 = vrot.slane %v222_v27, 2  ;;  %v235_v37 = vrot.slane %v210_v26, 3  ;;  %v246_v40 = vrot.slane %v209_v28, 4  ;;  %v245_v42 = vrot.slane %v208_v31, 4 }
  0xbb   : > { %v221_v34 = vadd.f32 %v216_v29, %v209_v28  ;;  %v217_v36 = vsel %vm214_vm0, %v215_v32, %v216_v29 }
  0xbc   : > { %v220_v39 = vadd.f32 %v217_v36, %v208_v31  ;;  %v229_v41 = vsel %vm226_vm1, %v227_v33, %v228_v30  ;;  %v237_v45 = vsel %vm234_vm2, %v235_v37, %v236_v35  ;;  %v247_v48 = vsel %vm244_vm3, %v245_v42, %v246_v40 }
  0xbd   : > { %v233_v38 = vadd.f32 %v228_v30, %v221_v34 }
  0xbe   : > { %v232_v44 = vadd.f32 %v229_v41, %v220_v39 }
  0xbf   : > { %v241_v43 = vadd.f32 %v236_v35, %v233_v38 }
  0xc0   : > { %v240_v47 = vadd.f32 %v237_v45, %v232_v44 }
  0xc1   : > { %v251_v46 = vadd.f32 %v246_v40, %v241_v43 }
  0xc2   : > { %v250_v49 = vadd.f32 %v247_v48, %v240_v47 }
  0xc3   : > { %255 = vst.msk [vmem:[%s158_s30 + $0x8] sm:$0xf] %vm254_vm4, %v251_v46 }
  0xc4   : > { %253 = vst.msk [vmem:[%s158_s30] sm:$0xff] %vm252_vm5, %v250_v49 }
  0xc5 PF: > { %s14_s11 = sadd.s32 1, %s506_s11   ;;  %s654_s6 = smov %s490_s7 }
  0xc6   : > { %p11_p9 = scmp.ge.s32.totalorder %s14_s11, 10   ;;  %s655_s7 = smov %s494_s8 }
  0xc7   : > { %s656_s8 = smov %s574_s18  ;;  %s657_s9 = smov %s502_s10 }
  0xc8   : > { %s658_s10 = smov %s660_s13  ;;  %13 = sbr.rel (!%p11_p9) target bundleno = 4 (0x4), region = 65 }
  0xcf   :  { %286 = vsyncpa [#allocation3], 1 }
  0xd0   :  { %288 = vsyncpa [#allocation3 + $0x1], 1 }

</bundles_post_ra>
